<compile_context>
chip_gen: v5e
topology: v5e:2x2
jax: 0.10.0
libtpu: 0.0.40
codegen_flags: <defaults>
</compile_context>

<pallas_src>
import functools

import jax
import jax.numpy as jnp
from jax.experimental import pallas as pl
from jax.experimental.pallas import tpu as pltpu


IN_FEATURES = 28 * 28   # 784
OUT_FEATURES = 256
MAX_BLOCK_B = 1024      # ~9 MiB of VMEM buffers; safe on v5e/v6e/v7x defaults


def _round_up(x, m):
    return ((x + m - 1) // m) * m


def _default_min_tiles():
    # v7x has 2 TensorCores per chip; with a single grid step one core idles
    # despite dimension_semantics=("parallel",).  Ask for >=2 tiles there.
    try:
        kind = jax.devices()[0].device_kind.lower()
    except Exception:
        return 1
    return 2 if "v7" in kind else 1


def _tile_plan(batch, max_block_b, min_tiles):
    """Pick (tile_rows, num_tiles, padded_batch) with balanced batch tiles."""
    if batch <= 8 or (batch <= max_block_b and min_tiles <= 1):
        # Single full-extent tile: block_shape == full array dims satisfies the
        # (8,128) rule, so no jnp.pad and no out[:B] slice are needed.
        return batch, 1, batch
    padded_b8 = _round_up(batch, 8)
    num_tiles = max(pl.cdiv(padded_b8, max_block_b),
                    min(min_tiles, padded_b8 // 8))
    tb = _round_up(pl.cdiv(padded_b8, num_tiles), 8)
    padded_b = tb * num_tiles
    return tb, num_tiles, padded_b


def _dense_kernel(x_ref, w_ref, b_ref, o_ref, *, activation, compute_dtype):
    # x_ref: (TB, 784) original dtype   w_ref: (784, 256) bf16 (VMEM-resident)
    # b_ref: (1, 256) f32               o_ref: (TB, 256) out dtype
    x = x_ref[...].astype(compute_dtype)        # VPU cast, hidden under the MXU
    acc = jnp.dot(x, w_ref[...], preferred_element_type=jnp.float32)
    acc = acc + b_ref[...]                      # bias add in f32
    if activation == "relu":
        acc = jnp.maximum(acc, 0.0)
    elif activation == "sigmoid":
        acc = jax.nn.sigmoid(acc)               # EUP, f32
    # else: identity
    o_ref[...] = acc.astype(o_ref.dtype)


def prepare_dense_params(w, b, compute_dtype=jnp.bfloat16):
    """One-time param conversion (do this at load time, NOT per forward call)."""
    return w.astype(compute_dtype), b.reshape(1, OUT_FEATURES).astype(jnp.float32)


def dense_layer(x_nchw, w, b, *, activation="relu", out_dtype=None,
                compute_dtype=jnp.bfloat16, max_block_b=MAX_BLOCK_B,
                min_tiles=None):
    """Forward of DenseLayer. x_nchw: (B, 1, 28, 28) (any leading batch)."""
    B = x_nchw.shape[0]
    # nn.Flatten(): flatten all dims except batch, row-major (matches PyTorch).
    x = x_nchw.reshape(B, -1)
    assert x.shape[1] == IN_FEATURES
    out_dtype = x_nchw.dtype if out_dtype is None else out_dtype
    if min_tiles is None:
        min_tiles = _default_min_tiles()

    # Fallback casts; for repeated calls use prepare_dense_params() so the
    # f32->bf16 weight HBM pass is not paid every forward.
    if w.dtype != compute_dtype:
        w = w.astype(compute_dtype)
    if b.ndim != 2 or b.dtype != jnp.float32:
        b = b.reshape(1, OUT_FEATURES).astype(jnp.float32)

    tb, num_tiles, padded_b = _tile_plan(B, max_block_b, min_tiles)
    if padded_b != B:
        x = jnp.pad(x, ((0, padded_b - B), (0, 0)))

    kernel = functools.partial(_dense_kernel, activation=activation,
                               compute_dtype=compute_dtype)
    out = pl.pallas_call(
        kernel,
        out_shape=jax.ShapeDtypeStruct((padded_b, OUT_FEATURES), out_dtype),
        grid_spec=pltpu.PrefetchScalarGridSpec(
            num_scalar_prefetch=0,
            grid=(num_tiles,),
            in_specs=[
                # x: one batch tile per grid step, original dtype (no boundary cast).
                pl.BlockSpec((tb, IN_FEATURES), lambda i: (i, 0)),
                # weight / bias: constant block -> DMA'd once, VMEM-resident.
                pl.BlockSpec((IN_FEATURES, OUT_FEATURES), lambda i: (0, 0)),
                pl.BlockSpec((1, OUT_FEATURES), lambda i: (0, 0)),
            ],
            out_specs=pl.BlockSpec((tb, OUT_FEATURES), lambda i: (i, 0)),
        ),
        compiler_params=pltpu.CompilerParams(
            dimension_semantics=("parallel",),   # batch tiles are independent
        ),
    )(x, w, b)

    if padded_b != B:
        out = out[:B]
    return out


if __name__ == "__main__":
    key = jax.random.PRNGKey(0)
    kx, kw, kb = jax.random.split(key, 3)

    # Deterministic synthetic parameters (Linear(784, 256)).
    w = jax.random.normal(kw, (IN_FEATURES, OUT_FEATURES), jnp.float32) * 0.02
    b = jax.random.normal(kb, (OUT_FEATURES,), jnp.float32) * 0.02

    # Small MNIST-like input: batch=2, channels=1, spatial=28x28.
    x = jax.random.normal(kx, (2, 1, 28, 28), jnp.float32)

    # One-time param prep: bf16 weight cached outside the per-call path.
    w_c, b_c = prepare_dense_params(w, b)

    cfg = {"activation": "relu"}
    out = dense_layer(x, w_c, b_c, activation=cfg["activation"])
    jax.block_until_ready(out)
    assert out.shape == (2, OUT_FEATURES) and out.dtype == jnp.float32

    xf = x.reshape(2, -1)
    # Reference matching the kernel's numerics (bf16 inputs, f32 accumulate).
    ref_bf16 = jnp.maximum(
        jnp.dot(xf.astype(jnp.bfloat16).astype(jnp.float32),
                w.astype(jnp.bfloat16).astype(jnp.float32)) + b, 0.0)
    # Full-f32 reference (sanity: bf16 quantization error only).
    ref_f32 = jnp.maximum(xf @ w + b, 0.0)

    assert jnp.allclose(out, ref_bf16, atol=2e-3, rtol=2e-3), "mismatch vs bf16 ref"
    assert jnp.allclose(out, ref_f32, atol=3e-2, rtol=3e-2), "mismatch vs f32 ref"

    # Reduced-precision output path (halves output HBM write traffic when the
    # downstream layer accepts bf16).
    out_bf16 = dense_layer(x, w_c, b_c, activation=cfg["activation"],
                           out_dtype=jnp.bfloat16)
    jax.block_until_ready(out_bf16)
    assert out_bf16.shape == (2, OUT_FEATURES) and out_bf16.dtype == jnp.bfloat16
    assert jnp.allclose(out_bf16.astype(jnp.float32), ref_f32,
                        atol=5e-2, rtol=5e-2), "mismatch vs f32 ref (bf16 out)"

    print("KERNEL_OK")
</pallas_src>

<mosaic_0001>
module attributes {stable_mosaic.version = 11 : i64} {
  func.func @_dense_kernel(%arg0: i32, %arg1: memref<2x784xf32, #tpu.memory_space<vmem>>, %arg2: memref<784x256xbf16, #tpu.memory_space<vmem>>, %arg3: memref<1x256xf32, #tpu.memory_space<vmem>>, %arg4: memref<2x256xf32, #tpu.memory_space<vmem>>) attributes {dimension_semantics = [#tpu.dimension_semantics<parallel>], iteration_bounds = array<i64: 1>, scalar_prefetch = 0 : i64, scratch_operands = 0 : i64, tpu.core_type = #tpu.core_type<tc>, window_params = [{transform_indices = @transform_0, window_bounds = array<i64: 2, 784>}, {pipeline_mode = #tpu.pipeline_mode<synchronous>, transform_indices = @transform_1, window_bounds = array<i64: 784, 256>}, {pipeline_mode = #tpu.pipeline_mode<synchronous>, transform_indices = @transform_2, window_bounds = array<i64: 1, 256>}, {transform_indices = @transform_3, window_bounds = array<i64: 2, 256>}]} {
    %c0 = arith.constant 0 : index
    %c0_0 = arith.constant 0 : index
    %0 = vector.load %arg1[%c0, %c0_0] : memref<2x784xf32, #tpu.memory_space<vmem>>, vector<2x784xf32>
    %1 = arith.truncf %0 : vector<2x784xf32> to vector<2x784xbf16>
    %c0_1 = arith.constant 0 : index
    %c0_2 = arith.constant 0 : index
    %2 = vector.load %arg2[%c0_1, %c0_2] : memref<784x256xbf16, #tpu.memory_space<vmem>>, vector<784x256xbf16>
    %cst = arith.constant dense<0.000000e+00> : vector<2x256xf32>
    %3 = tpu.matmul %1, %2, %cst {dimension_numbers = #tpu.dot_dimension_numbers<[1], [0], [0], [1], [0, 0, 1, 1], [], []>} : vector<2x784xbf16>, vector<784x256xbf16>, vector<2x256xf32> -> vector<2x256xf32>
    %c0_3 = arith.constant 0 : index
    %c0_4 = arith.constant 0 : index
    %4 = vector.load %arg3[%c0_3, %c0_4] : memref<1x256xf32, #tpu.memory_space<vmem>>, vector<1x256xf32>
    %5 = vector.broadcast %4 : vector<1x256xf32> to vector<2x256xf32>
    %6 = arith.addf %3, %5 : vector<2x256xf32>
    %cst_5 = arith.constant 0.000000e+00 : f32
    %7 = vector.broadcast %cst_5 : f32 to vector<2x256xf32>
    %8 = arith.maximumf %6, %7 : vector<2x256xf32>
    %c0_6 = arith.constant 0 : index
    %c0_7 = arith.constant 0 : index
    %9 = vector.load %arg4[%c0_6, %c0_7] : memref<2x256xf32, #tpu.memory_space<vmem>>, vector<2x256xf32>
    tpu.vector_store %arg4[%c0_6, %c0_7], %8 {strides = array<i32>} : memref<2x256xf32, #tpu.memory_space<vmem>>, vector<2x256xf32>,
    return
  }
  func.func @transform_0(%arg0: i32) -> (i32, i32) {
    %c0_i32 = arith.constant 0 : i32
    %c0_i32_0 = arith.constant 0 : i32
    return %arg0, %c0_i32 : i32, i32
  }
  func.func @transform_1(%arg0: i32) -> (i32, i32) {
    %c0_i32 = arith.constant 0 : i32
    %c0_i32_0 = arith.constant 0 : i32
    %c0_i32_1 = arith.constant 0 : i32
    return %c0_i32, %c0_i32_0 : i32, i32
  }
  func.func @transform_2(%arg0: i32) -> (i32, i32) {
    %c0_i32 = arith.constant 0 : i32
    %c0_i32_0 = arith.constant 0 : i32
    %c0_i32_1 = arith.constant 0 : i32
    return %c0_i32, %c0_i32_0 : i32, i32
  }
  func.func @transform_3(%arg0: i32) -> (i32, i32) {
    %c0_i32 = arith.constant 0 : i32
    %c0_i32_0 = arith.constant 0 : i32
    return %arg0, %c0_i32 : i32, i32
  }
}

</mosaic_0001>

<bundles_post_ra>
// kernel: tpu_custom_call.1
= control target key start
LH: loop header
LB: loop body
LE: loop exit
PB: predicated region body
PF: predicated region fallthrough
CT: control target
= control target key end

     0   :  { %8 = vsyncpa [#allocation3], 0  ;;  %s1562_s0 = inlined_call_operand.hbm [shape: f32[2,784], index: 0, kind: input, shape index: {}]   ;;  %s1563_s1 = inlined_call_operand.hbm [shape: bf16[784,256], index: 1, kind: input, shape index: {}]   ;;  %s1564_s2 = inlined_call_operand.hbm [shape: f32[1,256], index: 2, kind: input, shape index: {}]   ;;  %s1565_s3 = inlined_call_operand.hbm [shape: f32[2,256], index: 3, kind: output, shape index: {}]  }
   0x1   :  { %9 = vsyncpa [#allocation6], 0  ;;  %s26_s14 = sshll.u32 %s1563_s1, 4  ;;  %s27_s14 = int_to_ptr.hbm [resolvable:$true] %s26_s14 }
   0x2   :  { %10 = vsyncpa [#allocation4], 0  ;;  %s1494_s15 = smov [#allocation5]   ;;  %s16_s19 = sshll.u32 %s1562_s0, 4  ;;  %s17_s19 = int_to_ptr.hbm [resolvable:$true] %s16_s19 }
   0x3   :  { %s28_s16 = sshll.u32 %s1494_s15, 4  ;;  %s1495_s20 = smov 128   ;;  %s29_s16 = int_to_ptr.vmem [resolvable:$true] %s28_s16 }
   0x4   :  { %s1496_s21 = smov 8   ;;  %s1497_s22 = smov [#allocation2]  }
   0x5   :  { %34 = dma.hbm_to_vmem [thread:$0]  %s27_s14, 12544, %s29_s16, [#allocation6], %s1495_s20, %s1495_s20, %s1496_s21  }
   0x6   :  { %s18_s23 = sshll.u32 %s1497_s22, 4  ;;  %s40_s26 = sshll.u32 %s1564_s2, 4  ;;  %s19_s23 = int_to_ptr.vmem [resolvable:$true] %s18_s23  ;;  %s41_s26 = int_to_ptr.hbm [resolvable:$true] %s40_s26 }
   0x7   :  { %21 = dma.hbm_to_vmem [thread:$0]  %s17_s19, 224, %s19_s23, [#allocation3]  }
   0x8   :  { %s1498_s1 = smov [#allocation7]  }
   0x9   :  { %s42_s27 = sshll.u32 %s1498_s1, 4  ;;  %s43_s27 = int_to_ptr.vmem [resolvable:$true] %s42_s27 }
   0xa   :  { %45 = dma.hbm_to_vmem [thread:$0]  %s41_s26, 32, %s43_s27, [#allocation6]  }
   0xb   :  { %1488 = dma.done.wait [#allocation3], 224  }
   0xc   :  { %1489 = vsyncadd [#allocation3], 4294967072 }
   0xd   :  { %1490 = dma.done.wait [#allocation6], 12576  }
   0xe   :  { %1491 = vsyncadd [#allocation6], 4294954720  ;;  %v952_v0 = vld [vmem:[#allocation5 + $0x70] sm:$0xf]  ;;  %v1303_v1 = vld [vmem:[#allocation5 + $0x74] sm:$0xf0] }
   0xf   :  { %v1080_v2 = vld [vmem:[#allocation5 + $0x170] sm:$0xf]  ;;  %v953_v3 = vor.u32 %v1303_v1, %v952_v0  ;;  %v1335_v4 = vld [vmem:[#allocation5 + $0x174] sm:$0xf0]  ;;  %v944_v11 = vld [vmem:[#allocation5 + $0x60] sm:$0xf] }
  0x10   :  { %v1144_v5 = vld [vmem:[#allocation5 + $0x1f0] sm:$0xf]  ;;  %v1351_v6 = vld [vmem:[#allocation5 + $0x1f4] sm:$0xf0]  ;;  %v1081_v7 = vor.u32 %v1335_v4, %v1080_v2  ;;  %v1301_v13 = vld [vmem:[#allocation5 + $0x64] sm:$0xf0] }
  0x11   :  { %v1145_v8 = vor.u32 %v1351_v6, %v1144_v5  ;;  %v1016_v9 = vld [vmem:[#allocation5 + $0xf0] sm:$0xf]  ;;  %v1319_v10 = vld [vmem:[#allocation5 + $0xf4] sm:$0xf0]  ;;  %685 = vmatpush.bf16.msra.mxu0 %v953_v3  ;;  %v1072_v14 = vld [vmem:[#allocation5 + $0x160] sm:$0xf]  ;;  %v945_v16 = vor.u32 %v1301_v13, %v944_v11 }
  0x12   :  { %v1017_v12 = vor.u32 %v1319_v10, %v1016_v9  ;;  %v1333_v15 = vld [vmem:[#allocation5 + $0x164] sm:$0xf0]  ;;  %711 = vmatpush.bf16.msra.mxu2 %v1081_v7  ;;  %v1136_v18 = vld [vmem:[#allocation5 + $0x1e0] sm:$0xf]  ;;  %v936_v23 = vld [vmem:[#allocation5 + $0x50] sm:$0xf] }
  0x13   :  { %724 = vmatpush.bf16.msra.mxu3 %v1145_v8  ;;  %v1073_v17 = vor.u32 %v1333_v15, %v1072_v14  ;;  %v1349_v19 = vld [vmem:[#allocation5 + $0x1e4] sm:$0xf0]  ;;  %v1008_v20 = vld [vmem:[#allocation5 + $0xe0] sm:$0xf]  ;;  %v1299_v24 = vld [vmem:[#allocation5 + $0x54] sm:$0xf0] }
  0x14   :  { %698 = vmatpush.bf16.msra.mxu1 %v1017_v12  ;;  %v1137_v21 = vor.u32 %v1349_v19, %v1136_v18  ;;  %v1317_v22 = vld [vmem:[#allocation5 + $0xe4] sm:$0xf0]  ;;  %v1064_v26 = vld [vmem:[#allocation5 + $0x150] sm:$0xf]  ;;  %v1331_v27 = vld [vmem:[#allocation5 + $0x154] sm:$0xf0]  ;;  %v937_v29 = vor.u32 %v1299_v24, %v936_v23 }
  0x15   :  { %v1009_v25 = vor.u32 %v1317_v22, %v1008_v20  ;;  %v1128_v28 = vld [vmem:[#allocation5 + $0x1d0] sm:$0xf]  ;;  %686 = vmatpush.bf16.msra.mxu0 %v945_v16  ;;  %v1347_v30 = vld [vmem:[#allocation5 + $0x1d4] sm:$0xf0]  ;;  %v1065_v33 = vor.u32 %v1331_v27, %v1064_v26  ;;  %v928_v35 = vld [vmem:[#allocation5 + $0x40] sm:$0xf] }
  0x16   :  { %v1000_v31 = vld [vmem:[#allocation5 + $0xd0] sm:$0xf]  ;;  %v1315_v32 = vld [vmem:[#allocation5 + $0xd4] sm:$0xf0]  ;;  %712 = vmatpush.bf16.msra.mxu2 %v1073_v17  ;;  %v1129_v34 = vor.u32 %v1347_v30, %v1128_v28  ;;  %v1297_v36 = vld [vmem:[#allocation5 + $0x44] sm:$0xf0] }
  0x17   :  { %725 = vmatpush.bf16.msra.mxu3 %v1137_v21  ;;  %v1056_v37 = vld [vmem:[#allocation5 + $0x140] sm:$0xf]  ;;  %v1001_v38 = vor.u32 %v1315_v32, %v1000_v31  ;;  %v1329_v39 = vld [vmem:[#allocation5 + $0x144] sm:$0xf0]  ;;  %v929_v44 = vor.u32 %v1297_v36, %v928_v35  ;;  %v920_v47 = vld [vmem:[#allocation5 + $0x30] sm:$0xf] }
  0x18   :  { %699 = vmatpush.bf16.msra.mxu1 %v1009_v25  ;;  %v1120_v40 = vld [vmem:[#allocation5 + $0x1c0] sm:$0xf]  ;;  %v1345_v41 = vld [vmem:[#allocation5 + $0x1c4] sm:$0xf0]  ;;  %v1057_v45 = vor.u32 %v1329_v39, %v1056_v37  ;;  %v1295_v48 = vld [vmem:[#allocation5 + $0x34] sm:$0xf0] }
  0x19   :  { %v992_v42 = vld [vmem:[#allocation5 + $0xc0] sm:$0xf]  ;;  %v1313_v43 = vld [vmem:[#allocation5 + $0xc4] sm:$0xf0]  ;;  %687 = vmatpush.bf16.msra.mxu0 %v937_v29  ;;  %v1121_v46 = vor.u32 %v1345_v41, %v1120_v40  ;;  %v1048_v49 = vld [vmem:[#allocation5 + $0x130] sm:$0xf]  ;;  %v921_v56 = vor.u32 %v1295_v48, %v920_v47 }
  0x1a   :  { %713 = vmatpush.bf16.msra.mxu2 %v1065_v33  ;;  %v993_v50 = vor.u32 %v1313_v43, %v992_v42  ;;  %v1327_v51 = vld [vmem:[#allocation5 + $0x134] sm:$0xf0]  ;;  %v1112_v52 = vld [vmem:[#allocation5 + $0x1b0] sm:$0xf]  ;;  %v912_v59 = vld [vmem:[#allocation5 + $0x20] sm:$0xf] }
  0x1b   :  { %726 = vmatpush.bf16.msra.mxu3 %v1129_v34  ;;  %v1343_v53 = vld [vmem:[#allocation5 + $0x1b4] sm:$0xf0]  ;;  %v984_v54 = vld [vmem:[#allocation5 + $0xb0] sm:$0xf]  ;;  %v1049_v57 = vor.u32 %v1327_v51, %v1048_v49  ;;  %v1293_v60 = vld [vmem:[#allocation5 + $0x24] sm:$0xf0] }
  0x1c   :  { %700 = vmatpush.bf16.msra.mxu1 %v1001_v38  ;;  %v1311_v55 = vld [vmem:[#allocation5 + $0xb4] sm:$0xf0]  ;;  %v1113_v58 = vor.u32 %v1343_v53, %v1112_v52  ;;  %v1040_v61 = vld [vmem:[#allocation5 + $0x120] sm:$0xf]  ;;  %v1325_v63 = vld [vmem:[#allocation5 + $0x124] sm:$0xf0]  ;;  %v913_v4 = vor.u32 %v1293_v60, %v912_v59 }
  0x1d   :  { %688 = vmatpush.bf16.msra.mxu0 %v929_v44  ;;  %v985_v62 = vor.u32 %v1311_v55, %v984_v54  ;;  %v1104_v0 = vld [vmem:[#allocation5 + $0x1a0] sm:$0xf]  ;;  %v1341_v1 = vld [vmem:[#allocation5 + $0x1a4] sm:$0xf0]  ;;  %v904_v5 = vld [vmem:[#allocation5 + $0x10] sm:$0xf]  ;;  %v1041_v7 = vor.u32 %v1325_v63, %v1040_v61 }
  0x1e   :  { %714 = vmatpush.bf16.msra.mxu2 %v1057_v45  ;;  %v976_v2 = vld [vmem:[#allocation5 + $0xa0] sm:$0xf]  ;;  %v1309_v3 = vld [vmem:[#allocation5 + $0xa4] sm:$0xf0]  ;;  %v1291_v6 = vld [vmem:[#allocation5 + $0x14] sm:$0xf0]  ;;  %v1105_v8 = vor.u32 %v1341_v1, %v1104_v0 }
  0x1f   :  { %727 = vmatpush.bf16.msra.mxu3 %v1121_v46  ;;  %v1032_v9 = vld [vmem:[#allocation5 + $0x110] sm:$0xf]  ;;  %v1323_v10 = vld [vmem:[#allocation5 + $0x114] sm:$0xf0]  ;;  %v977_v12 = vor.u32 %v1309_v3, %v976_v2  ;;  %v896_v16 = vld [vmem:[#allocation5] sm:$0xf]  ;;  %v905_v19 = vor.u32 %v1291_v6, %v904_v5 }
  0x20   :  { %701 = vmatpush.bf16.msra.mxu1 %v993_v50  ;;  %v1096_v11 = vld [vmem:[#allocation5 + $0x190] sm:$0xf]  ;;  %v1339_v13 = vld [vmem:[#allocation5 + $0x194] sm:$0xf0]  ;;  %v1289_v17 = vld [vmem:[#allocation5 + $0x4] sm:$0xf0]  ;;  %v1033_v22 = vor.u32 %v1323_v10, %v1032_v9 }
  0x21   :  { %689 = vmatpush.bf16.msra.mxu0 %v921_v56  ;;  %v968_v14 = vld [vmem:[#allocation5 + $0x90] sm:$0xf]  ;;  %v1307_v15 = vld [vmem:[#allocation5 + $0x94] sm:$0xf0]  ;;  %v1024_v20 = vld [vmem:[#allocation5 + $0x100] sm:$0xf]  ;;  %v1097_v23 = vor.u32 %v1339_v13, %v1096_v11  ;;  %v897_v34 = vor.u32 %v1289_v17, %v896_v16 }
  0x22   :  { %715 = vmatpush.bf16.msra.mxu2 %v1049_v57  ;;  %v59_v18 = vld [vmem:[#allocation2] sm:$0xff]  ;;  %v1321_v21 = vld [vmem:[#allocation5 + $0x104] sm:$0xf0]  ;;  %v1088_v24 = vld [vmem:[#allocation5 + $0x180] sm:$0xf]  ;;  %v969_v27 = vor.u32 %v1307_v15, %v968_v14  ;;  %vm681_vm0 = vcmask 130048  }
  0x23   :  { %728 = vmatpush.bf16.msra.mxu3 %v1113_v58  ;;  %63 = vst [vmem:[#allocation1] ss:$4 sm:$0xff] %v59_v18  ;;  %v1337_v25 = vld [vmem:[#allocation5 + $0x184] sm:$0xf0]  ;;  %v1208_v26 = vld [vmem:[#allocation5 + $0x270] sm:$0xf]  ;;  %v1025_v38 = vor.u32 %v1321_v21, %v1024_v20 }
  0x24   :  { %702 = vmatpush.bf16.msra.mxu1 %v985_v62  ;;  %v1367_v28 = vld [vmem:[#allocation5 + $0x274] sm:$0xf0]  ;;  %v1302_v29 = vld [vmem:[#allocation5 + $0x74] sm:$0xf]  ;;  %v954_v30 = vld [vmem:[#allocation5 + $0x78] sm:$0xf0]  ;;  %v1089_v39 = vor.u32 %v1337_v25, %v1088_v24 }
  0x25   :  { %690 = vmatpush.bf16.msra.mxu0 %v913_v4  ;;  %v960_v31 = vld [vmem:[#allocation5 + $0x80] sm:$0xf]  ;;  %v1305_v32 = vld [vmem:[#allocation5 + $0x84] sm:$0xf0]  ;;  %v1272_v33 = vld [vmem:[#allocation5 + $0x2f0] sm:$0xf]  ;;  %v1209_v43 = vor.u32 %v1367_v28, %v1208_v26  ;;  %v957_v44 = vor.u32 %v1302_v29, %v954_v30 }
  0x26   :  { %716 = vmatpush.bf16.msra.mxu2 %v1041_v7  ;;  %v1383_v35 = vld [vmem:[#allocation5 + $0x2f4] sm:$0xf0]  ;;  %v1280_v36 = vld [vmem:[#allocation5 + $0x300] sm:$0xf]  ;;  %v1385_v37 = vld [vmem:[#allocation5 + $0x304] sm:$0xf0]  ;;  %v961_v48 = vor.u32 %v1305_v32, %v960_v31 }
  0x27   :  { %729 = vmatpush.bf16.msra.mxu3 %v1105_v8  ;;  %v1318_v40 = vld [vmem:[#allocation5 + $0xf4] sm:$0xf]  ;;  %v1018_v41 = vld [vmem:[#allocation5 + $0xf8] sm:$0xf0]  ;;  %v1200_v42 = vld [vmem:[#allocation5 + $0x260] sm:$0xf]  ;;  %v1281_v50 = vor.u32 %v1385_v37, %v1280_v36  ;;  %v1273_v53 = vor.u32 %v1383_v35, %v1272_v33 }
  0x28   :  { %703 = vmatpush.bf16.msra.mxu1 %v977_v12  ;;  %v1365_v45 = vld [vmem:[#allocation5 + $0x264] sm:$0xf0]  ;;  %v1300_v46 = vld [vmem:[#allocation5 + $0x64] sm:$0xf]  ;;  %v946_v47 = vld [vmem:[#allocation5 + $0x68] sm:$0xf0]  ;;  %v1021_v56 = vor.u32 %v1318_v40, %v1018_v41 }
  0x29   :  { %691 = vmatpush.bf16.msra.mxu0 %v905_v19  ;;  %v1264_v54 = vld [vmem:[#allocation5 + $0x2e0] sm:$0xf]  ;;  %v1381_v57 = vld [vmem:[#allocation5 + $0x2e4] sm:$0xf0]  ;;  %v1201_v60 = vor.u32 %v1365_v45, %v1200_v42  ;;  %v949_v61 = vor.u32 %v1300_v46, %v946_v47  ;;  %v1316_v62 = vld [vmem:[#allocation5 + $0xe4] sm:$0xf] }
  0x2a   :  { %717 = vmatpush.bf16.msra.mxu2 %v1033_v22  ;;  %v68_v49 = vld.sshfl [vmem:[#allocation1 + $0x10] sm:$0xff pattern:$0x73625140]  ;;  %v66_v51 = vld.sshfl [vmem:[#allocation1] sm:$0xff pattern:$0x73625140]  ;;  %v1265_v6 = vor.u32 %v1381_v57, %v1264_v54 }
  0x2b   :  { %730 = vmatpush.bf16.msra.mxu3 %v1097_v23  ;;  %v1529_v52 = vpack.c.bf16 %v68_v49, %v68_v49  ;;  %v69_v55 = vld.sshfl [vmem:[#allocation1 + $0x18] sm:$0xff pattern:$0x73625140]  ;;  %v1531_v58 = vpack.c.bf16 %v66_v51, %v66_v51  ;;  %v67_v59 = vld.sshfl [vmem:[#allocation1 + $0x8] sm:$0xff pattern:$0x73625140] }
  0x2c   :  { %704 = vmatpush.bf16.msra.mxu1 %v969_v27  ;;  %v1010_v63 = vld [vmem:[#allocation5 + $0xe8] sm:$0xf0]  ;;  %v1192_v0 = vld [vmem:[#allocation5 + $0x250] sm:$0xf]  ;;  %v1363_v1 = vld [vmem:[#allocation5 + $0x254] sm:$0xf0]  ;;  %v1533_v4 = vpack.c.bf16 %v69_v55, %v69_v55  ;;  %v1535_v5 = vpack.c.bf16 %v67_v59, %v67_v59 }
  0x2d   :  { %692 = vmatpush.bf16.msra.mxu0 %v897_v34  ;;  %v1298_v2 = vld [vmem:[#allocation5 + $0x54] sm:$0xf]  ;;  %v938_v3 = vld [vmem:[#allocation5 + $0x58] sm:$0xf0]  ;;  %v1013_v7 = vor.u32 %v1316_v62, %v1010_v63  ;;  %v1256_v8 = vld [vmem:[#allocation5 + $0x2d0] sm:$0xf]  ;;  %v1193_v10 = vor.u32 %v1363_v1, %v1192_v0 }
  0x2e   :  { %718 = vmatpush.bf16.msra.mxu2 %v1025_v38  ;;  %v1379_v9 = vld [vmem:[#allocation5 + $0x2d4] sm:$0xf0]  ;;  %v941_v11 = vor.u32 %v1298_v2, %v938_v3  ;;  %v1314_v12 = vld [vmem:[#allocation5 + $0xd4] sm:$0xf]  ;;  %v1002_v13 = vld [vmem:[#allocation5 + $0xd8] sm:$0xf0] }
  0x2f   :  { %731 = vmatpush.bf16.msra.mxu3 %v1089_v39  ;;  %v1184_v14 = vld [vmem:[#allocation5 + $0x240] sm:$0xf]  ;;  %v1361_v15 = vld [vmem:[#allocation5 + $0x244] sm:$0xf0]  ;;  %v1296_v16 = vld [vmem:[#allocation5 + $0x44] sm:$0xf]  ;;  %v1257_v18 = vor.u32 %v1379_v9, %v1256_v8  ;;  %v1005_v19 = vor.u32 %v1314_v12, %v1002_v13 }
  0x30   :  { %705 = vmatpush.bf16.msra.mxu1 %v961_v48  ;;  %693 = vmatmul.bf16.vlgmr.msra.gmra.mxu0 %v1531_v58  ;;  %v930_v17 = vld [vmem:[#allocation5 + $0x48] sm:$0xf0]  ;;  %v1248_v20 = vld [vmem:[#allocation5 + $0x2c0] sm:$0xf]  ;;  %v1377_v21 = vld [vmem:[#allocation5 + $0x2c4] sm:$0xf0]  ;;  %v1185_v22 = vor.u32 %v1361_v15, %v1184_v14 }
  0x31   :  { %737 = vmatpush.bf16.msrb.mxu0 %v1209_v43  ;;  %719 = vmatmul.bf16.vlgmr.msra.gmra.mxu2 %v1529_v52  ;;  %v933_v23 = vor.u32 %v1296_v16, %v930_v17  ;;  %v1312_v24 = vld [vmem:[#allocation5 + $0xc4] sm:$0xf]  ;;  %v994_v25 = vld [vmem:[#allocation5 + $0xc8] sm:$0xf0]  ;;  %v1176_v26 = vld [vmem:[#allocation5 + $0x230] sm:$0xf]  ;;  %v1249_v30 = vor.u32 %v1377_v21, %v1248_v20 }
  0x32   :  { %770 = vmatpush.bf16.msrb.mxu2 %v1281_v50  ;;  %732 = vmatmul.bf16.vlgmr.msra.gmra.mxu3 %v1533_v4  ;;  %v1359_v27 = vld [vmem:[#allocation5 + $0x234] sm:$0xf0]  ;;  %v1294_v28 = vld [vmem:[#allocation5 + $0x34] sm:$0xf]  ;;  %v922_v29 = vld [vmem:[#allocation5 + $0x38] sm:$0xf0]  ;;  %v997_v32 = vor.u32 %v1312_v24, %v994_v25 }
  0x33   :  { %776 = vmatpush.bf16.msrb.mxu3 %v957_v44  ;;  %706 = vmatmul.bf16.vlgmr.msra.gmra.mxu1 %v1535_v5  ;;  %v1240_v31 = vld [vmem:[#allocation5 + $0x2b0] sm:$0xf]  ;;  %v1375_v33 = vld [vmem:[#allocation5 + $0x2b4] sm:$0xf0]  ;;  %v1310_v34 = vld [vmem:[#allocation5 + $0xb4] sm:$0xf]  ;;  %v1177_v36 = vor.u32 %v1359_v27, %v1176_v26  ;;  %v925_v37 = vor.u32 %v1294_v28, %v922_v29 }
  0x34   :  { %750 = vmatpush.bf16.msrb.mxu1 %v1273_v53  ;;  %v60_v35 = vld [vmem:[#allocation2 + $0x8] sm:$0x3f]  ;;  %v1168_v39 = vld [vmem:[#allocation5 + $0x220] sm:$0xf]  ;;  %v1357_v40 = vld [vmem:[#allocation5 + $0x224] sm:$0xf0]  ;;  %v1241_v43 = vor.u32 %v1375_v33, %v1240_v31 }
  0x35   :  { %738 = vmatpush.bf16.msrb.mxu0 %v1201_v60  ;;  %v986_v38 = vld [vmem:[#allocation5 + $0xb8] sm:$0xf0]  ;;  %65 = vst [vmem:[#allocation1 + $0x20] ss:$4 sm:$0xff] %v60_v35  ;;  %v1292_v41 = vld [vmem:[#allocation5 + $0x24] sm:$0xf]  ;;  %v1169_v48 = vor.u32 %v1357_v40, %v1168_v39 }
  0x36   :  { %789 = vmatpush.bf16.msra.mxu2 %v1021_v56  ;;  %v914_v42 = vld [vmem:[#allocation5 + $0x28] sm:$0xf0]  ;;  %v989_v44 = vor.u32 %v1310_v34, %v986_v38  ;;  %v1232_v45 = vld [vmem:[#allocation5 + $0x2a0] sm:$0xf]  ;;  %v1373_v46 = vld [vmem:[#allocation5 + $0x2a4] sm:$0xf0] }
  0x37   :  { %777 = vmatpush.bf16.msrb.mxu3 %v949_v61  ;;  %v1308_v47 = vld [vmem:[#allocation5 + $0xa4] sm:$0xf]  ;;  %v917_v49 = vor.u32 %v1292_v41, %v914_v42  ;;  %v978_v50 = vld [vmem:[#allocation5 + $0xa8] sm:$0xf0]  ;;  %v1160_v51 = vld [vmem:[#allocation5 + $0x210] sm:$0xf]  ;;  %v1233_v57 = vor.u32 %v1373_v46, %v1232_v45 }
  0x38   :  { %751 = vmatpush.bf16.msrb.mxu1 %v1265_v6  ;;  %v1355_v53 = vld [vmem:[#allocation5 + $0x214] sm:$0xf0]  ;;  %v1290_v54 = vld [vmem:[#allocation5 + $0x14] sm:$0xf]  ;;  %v906_v55 = vld [vmem:[#allocation5 + $0x18] sm:$0xf0]  ;;  %v981_v62 = vor.u32 %v1308_v47, %v978_v50 }
  0x39   :  { %739 = vmatpush.bf16.msrb.mxu0 %v1193_v10  ;;  %v1224_v56 = vld [vmem:[#allocation5 + $0x290] sm:$0xf]  ;;  %v1371_v59 = vld [vmem:[#allocation5 + $0x294] sm:$0xf0]  ;;  %v1306_v60 = vld [vmem:[#allocation5 + $0x94] sm:$0xf]  ;;  %v1161_v1 = vor.u32 %v1355_v53, %v1160_v51  ;;  %v909_v2 = vor.u32 %v1290_v54, %v906_v55 }
  0x3a   :  { %790 = vmatpush.bf16.msra.mxu2 %v1013_v7  ;;  %v970_v61 = vld [vmem:[#allocation5 + $0x98] sm:$0xf0]  ;;  %v1152_v63 = vld [vmem:[#allocation5 + $0x200] sm:$0xf]  ;;  %v1353_v3 = vld [vmem:[#allocation5 + $0x204] sm:$0xf0]  ;;  %v1225_v12 = vor.u32 %v1371_v59, %v1224_v56 }
  0x3b   :  { %778 = vmatpush.bf16.msrb.mxu3 %v941_v11  ;;  %v1288_v7 = vld [vmem:[#allocation5 + $0x4] sm:$0xf]  ;;  %v898_v8 = vld [vmem:[#allocation5 + $0x8] sm:$0xf0]  ;;  %v1334_v9 = vld [vmem:[#allocation5 + $0x174] sm:$0xf]  ;;  %v973_v16 = vor.u32 %v1306_v60, %v970_v61  ;;  %v1153_v20 = vor.u32 %v1353_v3, %v1152_v63 }
  0x3c   :  { %752 = vmatpush.bf16.msrb.mxu1 %v1257_v18  ;;  %v72_v0 = vld.sshfl [vmem:[#allocation1 + $0x30] sm:$0xff pattern:$0x73625140]  ;;  %v1366_v11 = vld [vmem:[#allocation5 + $0x274] sm:$0xf]  ;;  %v901_v21 = vor.u32 %v1288_v7, %v898_v8  ;;  %s1499_s0 = smov [#allocation8]  }
  0x3d   :  { %740 = vmatpush.bf16.msrb.mxu0 %v1185_v22  ;;  %v1541_v6 = vpack.c.bf16 %v72_v0, %v72_v0  ;;  %v1082_v10 = vld [vmem:[#allocation5 + $0x178] sm:$0xf0]  ;;  %v1216_v14 = vld [vmem:[#allocation5 + $0x280] sm:$0xf]  ;;  %v1369_v15 = vld [vmem:[#allocation5 + $0x284] sm:$0xf0] }
  0x3e   :  { %791 = vmatpush.bf16.msra.mxu2 %v1005_v19  ;;  %v1210_v13 = vld [vmem:[#allocation5 + $0x278] sm:$0xf0]  ;;  %v1304_v17 = vld [vmem:[#allocation5 + $0x84] sm:$0xf]  ;;  %v962_v18 = vld [vmem:[#allocation5 + $0x88] sm:$0xf0]  ;;  %v1085_v24 = vor.u32 %v1334_v9, %v1082_v10  ;;  %v1217_v29 = vor.u32 %v1369_v15, %v1216_v14 }
  0x3f   :  { %779 = vmatpush.bf16.msrb.mxu3 %v933_v23  ;;  %v1350_v19 = vld [vmem:[#allocation5 + $0x1f4] sm:$0xf]  ;;  %v70_v22 = vld.sshfl [vmem:[#allocation1 + $0x20] sm:$0xff pattern:$0x73625140]  ;;  %v1213_v25 = vor.u32 %v1366_v11, %v1210_v13  ;;  %v965_v33 = vor.u32 %v1304_v17, %v962_v18  ;;  %s881_s2 = sshll.u32 %s1499_s0, 4  ;;  %s882_s2 = int_to_ptr.vmem [resolvable:$true] %s881_s2 }
  0x40   :  { %753 = vmatpush.bf16.msrb.mxu1 %v1249_v30  ;;  %v1146_v23 = vld [vmem:[#allocation5 + $0x1f8] sm:$0xf0]  ;;  %v1382_v26 = vld [vmem:[#allocation5 + $0x2f4] sm:$0xf]  ;;  %v1332_v28 = vld [vmem:[#allocation5 + $0x164] sm:$0xf] }
  0x41   :  { %741 = vmatpush.bf16.msrb.mxu0 %v1177_v36  ;;  %1286 = vmatmul.msk.bf16.vlgmr.msrb.gmra.mxu2 %vm681_vm0, %v1541_v6  ;;  %v1274_v27 = vld [vmem:[#allocation5 + $0x2f8] sm:$0xf0]  ;;  %v71_v30 = vld.sshfl [vmem:[#allocation1 + $0x28] sm:$0xff pattern:$0x73625140]  ;;  %v1149_v36 = vor.u32 %v1350_v19, %v1146_v23  ;;  %s883_s30 = sshll.u32 %s1565_s3, 4  ;;  %s884_s30 = int_to_ptr.hbm [resolvable:$true] %s883_s30 }
  0x42   :  { %792 = vmatpush.bf16.msra.mxu2 %v997_v32  ;;  %v1074_v31 = vld [vmem:[#allocation5 + $0x168] sm:$0xf0]  ;;  %v1545_v32 = vpack.c.bf16 %v70_v22, %v70_v22  ;;  %v1364_v34 = vld [vmem:[#allocation5 + $0x264] sm:$0xf]  ;;  %v1547_v39 = vpack.c.bf16 %v71_v30, %v71_v30  ;;  %v1330_v45 = vld [vmem:[#allocation5 + $0x154] sm:$0xf] }
  0x43   :  { %780 = vmatpush.bf16.msrb.mxu3 %v925_v37  ;;  %v1202_v35 = vld [vmem:[#allocation5 + $0x268] sm:$0xf0]  ;;  %v1277_v37 = vor.u32 %v1382_v26, %v1274_v27  ;;  %v1348_v38 = vld [vmem:[#allocation5 + $0x1e4] sm:$0xf]  ;;  %v1077_v40 = vor.u32 %v1332_v28, %v1074_v31  ;;  %v1066_v46 = vld [vmem:[#allocation5 + $0x158] sm:$0xf0] }
  0x44   :  { %754 = vmatpush.bf16.msrb.mxu1 %v1241_v43  ;;  %v1138_v41 = vld [vmem:[#allocation5 + $0x1e8] sm:$0xf0]  ;;  %v1380_v42 = vld [vmem:[#allocation5 + $0x2e4] sm:$0xf]  ;;  %v1362_v47 = vld [vmem:[#allocation5 + $0x254] sm:$0xf]  ;;  %v1069_v53 = vor.u32 %v1330_v45, %v1066_v46 }
  0x45   :  { %742 = vmatpush.bf16.msrb.mxu0 %v1169_v48  ;;  %v1266_v43 = vld [vmem:[#allocation5 + $0x2e8] sm:$0xf0]  ;;  %v1194_v48 = vld [vmem:[#allocation5 + $0x258] sm:$0xf0]  ;;  %v1346_v51 = vld [vmem:[#allocation5 + $0x1d4] sm:$0xf] }
  0x46   :  { %793 = vmatpush.bf16.msra.mxu2 %v989_v44  ;;  %v1205_v44 = vor.u32 %v1364_v34, %v1202_v35  ;;  %v1269_v50 = vor.u32 %v1380_v42, %v1266_v43  ;;  %v1130_v54 = vld [vmem:[#allocation5 + $0x1d8] sm:$0xf0]  ;;  %v1378_v55 = vld [vmem:[#allocation5 + $0x2d4] sm:$0xf]  ;;  %v1328_v59 = vld [vmem:[#allocation5 + $0x144] sm:$0xf] }
  0x47   :  { %781 = vmatpush.bf16.msrb.mxu3 %v917_v49  ;;  %v1141_v49 = vor.u32 %v1348_v38, %v1138_v41  ;;  %v1258_v56 = vld [vmem:[#allocation5 + $0x2d8] sm:$0xf0]  ;;  %v1058_v60 = vld [vmem:[#allocation5 + $0x148] sm:$0xf0]  ;;  %v1360_v61 = vld [vmem:[#allocation5 + $0x244] sm:$0xf]  ;;  %v1133_v63 = vor.u32 %v1346_v51, %v1130_v54 }
  0x48   :  { %755 = vmatpush.bf16.msrb.mxu1 %v1233_v57  ;;  %v1197_v57 = vor.u32 %v1362_v47, %v1194_v48  ;;  %v1261_v0 = vor.u32 %v1378_v55, %v1258_v56  ;;  %v1122_v3 = vld [vmem:[#allocation5 + $0x1c8] sm:$0xf0]  ;;  %v1376_v7 = vld [vmem:[#allocation5 + $0x2c4] sm:$0xf]  ;;  %v1326_v10 = vld [vmem:[#allocation5 + $0x134] sm:$0xf] }
  0x49   :  { %743 = vmatpush.bf16.msrb.mxu0 %v1161_v1  ;;  %v1344_v1 = vld [vmem:[#allocation5 + $0x1c4] sm:$0xf]  ;;  %v1250_v8 = vld [vmem:[#allocation5 + $0x2c8] sm:$0xf0]  ;;  %v1050_v11 = vld [vmem:[#allocation5 + $0x138] sm:$0xf0] }
  0x4a   :  { %794 = vmatpush.bf16.msra.mxu2 %v981_v62  ;;  %v1186_v62 = vld [vmem:[#allocation5 + $0x248] sm:$0xf0]  ;;  %v1178_v13 = vld [vmem:[#allocation5 + $0x238] sm:$0xf0]  ;;  %v1253_v14 = vor.u32 %v1376_v7, %v1250_v8  ;;  %v1342_v15 = vld [vmem:[#allocation5 + $0x1b4] sm:$0xf] }
  0x4b   :  { %782 = vmatpush.bf16.msrb.mxu3 %v909_v2  ;;  %v1061_v2 = vor.u32 %v1328_v59, %v1058_v60  ;;  %v1189_v9 = vor.u32 %v1360_v61, %v1186_v62  ;;  %v1114_v17 = vld [vmem:[#allocation5 + $0x1b8] sm:$0xf0]  ;;  %v1374_v18 = vld [vmem:[#allocation5 + $0x2b4] sm:$0xf]  ;;  %v1042_v22 = vld [vmem:[#allocation5 + $0x128] sm:$0xf0] }
  0x4c   :  { %756 = vmatpush.bf16.msrb.mxu1 %v1225_v12  ;;  %v1358_v12 = vld [vmem:[#allocation5 + $0x234] sm:$0xf]  ;;  %v1242_v19 = vld [vmem:[#allocation5 + $0x2b8] sm:$0xf0]  ;;  %v1356_v23 = vld [vmem:[#allocation5 + $0x224] sm:$0xf] }
  0x4d   :  { %744 = vmatpush.bf16.msrb.mxu0 %v1153_v20  ;;  %v1181_v20 = vor.u32 %v1358_v12, %v1178_v13  ;;  %v1340_v26 = vld [vmem:[#allocation5 + $0x1a4] sm:$0xf]  ;;  %v1106_v28 = vld [vmem:[#allocation5 + $0x1a8] sm:$0xf0]  ;;  %v1034_v34 = vld [vmem:[#allocation5 + $0x118] sm:$0xf0] }
  0x4e   :  { %795 = vmatpush.bf16.msra.mxu2 %v973_v16  ;;  %v1053_v16 = vor.u32 %v1326_v10, %v1050_v11  ;;  %v1234_v30 = vld [vmem:[#allocation5 + $0x2a8] sm:$0xf0]  ;;  %v1354_v35 = vld [vmem:[#allocation5 + $0x214] sm:$0xf]  ;;  %v1098_v42 = vld [vmem:[#allocation5 + $0x198] sm:$0xf0] }
  0x4f   :  { %783 = vmatpush.bf16.msrb.mxu3 %v901_v21  ;;  %v1324_v21 = vld [vmem:[#allocation5 + $0x124] sm:$0xf]  ;;  %v1370_v43 = vld [vmem:[#allocation5 + $0x294] sm:$0xf]  ;;  %v1026_v47 = vld [vmem:[#allocation5 + $0x108] sm:$0xf0] }
  0x50   :  { %757 = vmatpush.bf16.msrb.mxu1 %v1217_v29  ;;  %745 = vmatmul.bf16.vlgmr.msrb.gmra.mxu0 %v1545_v32  ;;  %v1045_v27 = vor.u32 %v1324_v21, %v1042_v22  ;;  %v1372_v29 = vld [vmem:[#allocation5 + $0x2a4] sm:$0xf]  ;;  %v1282_v51 = vld [vmem:[#allocation5 + $0x308] sm:$0xf0]  ;;  %vm872_vm1 = vcmask 1041408  }
  0x51   :  { %802 = vmatpush.bf16.msra.mxu0 %v1085_v24  ;;  %v1117_v24 = vor.u32 %v1342_v15, %v1114_v17  ;;  %v1237_v38 = vor.u32 %v1372_v29, %v1234_v30  ;;  %v1320_v46 = vld [vmem:[#allocation5 + $0x104] sm:$0xf]  ;;  %v1218_v61 = vld [vmem:[#allocation5 + $0x288] sm:$0xf0] }
  0x52   :  { %796 = vmatpush.bf16.msra.mxu2 %v965_v33  ;;  %784 = vmatmul.bf16.vlgmr.msrb.gmra.mxu3 %v1531_v58  ;;  %v1125_v58 = vor.u32 %v1344_v1, %v1122_v3  ;;  %v1322_v33 = vld [vmem:[#allocation5 + $0x114] sm:$0xf]  ;;  %v1352_v48 = vld [vmem:[#allocation5 + $0x204] sm:$0xf]  ;;  %v1029_v55 = vor.u32 %v1320_v46, %v1026_v47 }
  0x53   :  { %828 = vmatpush.bf16.msra.mxu3 %v1213_v25  ;;  %758 = vmatmul.bf16.vlgmr.msrb.gmra.mxu1 %v1547_v39  ;;  %v1245_v25 = vor.u32 %v1374_v18, %v1242_v19  ;;  %v1037_v41 = vor.u32 %v1322_v33, %v1034_v34  ;;  %v1336_v56 = vld [vmem:[#allocation5 + $0x184] sm:$0xf] }
  0x54   :  { %815 = vmatpush.bf16.msra.mxu1 %v1149_v36  ;;  %v1162_v36 = vld [vmem:[#allocation5 + $0x218] sm:$0xf0]  ;;  %v1368_v60 = vld [vmem:[#allocation5 + $0x284] sm:$0xf] }
  0x55   :  { %803 = vmatpush.bf16.msra.mxu0 %v1077_v40  ;;  %797 = vmatmul.bf16.vlgmr.msra.gmra.mxu2 %v1535_v5  ;;  %v1170_v5 = vld [vmem:[#allocation5 + $0x228] sm:$0xf0]  ;;  %v1338_v40 = vld [vmem:[#allocation5 + $0x194] sm:$0xf]  ;;  %v1165_v45 = vor.u32 %v1354_v35, %v1162_v36 }
  0x56   :  { %841 = vmatpush.bf16.msrb.mxu2 %v1277_v37  ;;  %v1173_v31 = vor.u32 %v1356_v23, %v1170_v5  ;;  %v1109_v37 = vor.u32 %v1340_v26, %v1106_v28 }
  0x57   :  { %829 = vmatpush.bf16.msra.mxu3 %v1205_v44  ;;  %v1226_v44 = vld [vmem:[#allocation5 + $0x298] sm:$0xf0] }
  0x58   :  { %816 = vmatpush.bf16.msra.mxu1 %v1141_v49  ;;  %v1154_v49 = vld [vmem:[#allocation5 + $0x208] sm:$0xf0]  ;;  %v1229_v54 = vor.u32 %v1370_v43, %v1226_v44 }
  0x59   :  { %804 = vmatpush.bf16.msra.mxu0 %v1069_v53  ;;  %v1101_v53 = vor.u32 %v1338_v40, %v1098_v42  ;;  %v1157_v59 = vor.u32 %v1352_v48, %v1154_v49 }
  0x5a   :  { %842 = vmatpush.bf16.msrb.mxu2 %v1269_v50  ;;  %v1384_v50 = vld [vmem:[#allocation5 + $0x304] sm:$0xf] }
  0x5b   :  { %830 = vmatpush.bf16.msra.mxu3 %v1197_v57  ;;  %v1090_v57 = vld [vmem:[#allocation5 + $0x188] sm:$0xf0]  ;;  %v1285_v62 = vor.u32 %v1384_v50, %v1282_v51 }
  0x5c   :  { %817 = vmatpush.bf16.msra.mxu1 %v1133_v63  ;;  %v1093_v63 = vor.u32 %v1336_v56, %v1090_v57 }
  0x5d   :  { %805 = vmatpush.bf16.msra.mxu0 %v1061_v2 }
  0x5e   :  { %843 = vmatpush.bf16.msrb.mxu2 %v1261_v0  ;;  %v1221_v0 = vor.u32 %v1368_v60, %v1218_v61 }
  0x5f   :  { %831 = vmatpush.bf16.msra.mxu3 %v1189_v9 }
  0x60   :  { %818 = vmatpush.bf16.msra.mxu1 %v1125_v58 }
  0x61   :  { %806 = vmatpush.bf16.msra.mxu0 %v1053_v16 }
  0x62   :  { %844 = vmatpush.bf16.msrb.mxu2 %v1253_v14 }
  0x63   :  { %832 = vmatpush.bf16.msra.mxu3 %v1181_v20 }
  0x64   :  { %819 = vmatpush.bf16.msra.mxu1 %v1117_v24 }
  0x65   :  { %807 = vmatpush.bf16.msra.mxu0 %v1045_v27 }
  0x66   :  { %845 = vmatpush.bf16.msrb.mxu2 %v1245_v25 }
  0x67   :  { %833 = vmatpush.bf16.msra.mxu3 %v1173_v31 }
  0x68   :  { %820 = vmatpush.bf16.msra.mxu1 %v1109_v37 }
  0x69   :  { %808 = vmatpush.bf16.msra.mxu0 %v1037_v41 }
  0x6a   :  { %846 = vmatpush.bf16.msrb.mxu2 %v1237_v38 }
  0x6b   :  { %834 = vmatpush.bf16.msra.mxu3 %v1165_v45 }
  0x6c   :  { %821 = vmatpush.bf16.msra.mxu1 %v1101_v53 }
  0x6d   :  { %809 = vmatpush.bf16.msra.mxu0 %v1029_v55 }
  0x6e   :  { %847 = vmatpush.bf16.msrb.mxu2 %v1229_v54 }
  0x6f   :  { %835 = vmatpush.bf16.msra.mxu3 %v1157_v59 }
  0x70   :  { %822 = vmatpush.bf16.msra.mxu1 %v1093_v63  ;;  %810 = vmatmul.bf16.vlgmr.msra.gmra.mxu0 %v1529_v52 }
  0x71   :  { %861 = vmatpush.bf16.msrb.mxu0 %v1285_v62 }
  0x72   :  { %836 = vmatmul.bf16.vlgmr.msra.gmra.mxu3 %v1545_v32  ;;  %848 = vmatpush.bf16.msrb.mxu2 %v1221_v0 }
  0x73   :  { %823 = vmatmul.bf16.vlgmr.msra.gmra.mxu1 %v1533_v4 }
  0x75   :  { %849 = vmatmul.bf16.vlgmr.msrb.gmra.mxu2 %v1547_v39  ;;  %v185_v39 = vld [vmem:[#allocation7] sm:$0x3] }
  0x76   :  { %v187_v17 = vperm.slane %v185_v39, 0  ;;  %v188_v18 = vperm.slane %v185_v39, 1 }
  0x80   :  { %1287 = vmatmul.msk.bf16.vlgmr.msrb.gmra.mxu0 %vm681_vm0, %v1541_v6 }
  0xad   :  { %v694_v1 = vpop.f32.mrf.mxu0 }
  0xae   :  { %v695_v19 = vadd.f32 %v694_v1, %v187_v17 }
  0xb0   :  { %v707_v2 = vpop.f32.mrf.mxu1 }
  0xb1   :  { %v708_v21 = vadd.f32 %v707_v2, %v695_v19 }
  0xb4   :  { %v720_v3 = vpop.f32.mrf.mxu2 }
  0xb5   :  { %v733_v7 = vpop.f32.mrf.mxu3  ;;  %v696_v8 = vpop.f32.mrf.mxu0  ;;  %v721_v5 = vadd.f32 %v720_v3, %v708_v21 }
  0xb7   :  { %v734_v26 = vadd.f32 %v733_v7, %v721_v5 }
  0xb8   :  { %v709_v9 = vpop.f32.mrf.mxu1 }
  0xbc   :  { %v722_v10 = vpop.f32.mrf.mxu2 }
  0xbd   :  { %v735_v11 = vpop.f32.mrf.mxu3 }
  0xc4   :  { %v772_v12 = vpop.f32.mrf.mxu2 }
  0xcc   :  { %v774_v32 = vpop.f32.mrf.mxu2 }
  0xcd   :  { %v746_v52 = vpop.f32.mrf.mxu0 }
  0xce   :  { %v747_v29 = vadd.f32 %v746_v52, %v734_v26 }
  0xd0   :  { %v759_v13 = vpop.f32.mrf.mxu1 }
  0xd1   :  { %v760_v35 = vadd.f32 %v759_v13, %v747_v29 }
  0xd3   :  { %v773_v40 = vadd.f32 %v772_v12, %v760_v35 }
  0xd5   :  { %v748_v58 = vpop.f32.mrf.mxu0  ;;  %v785_v14 = vpop.f32.mrf.mxu3  ;;  %v867_v44 = vmax.f32 %v773_v40, 0.0 }
  0xd6   :  { %v786_v20 = vadd.f32 %v785_v14, %v188_v18 }
  0xd8   :  { %v761_v4 = vpop.f32.mrf.mxu1  ;;  %v798_v15 = vpop.f32.mrf.mxu2 }
  0xd9   :  { %v799_v23 = vadd.f32 %v798_v15, %v786_v20 }
  0xdd   :  { %v787_v16 = vpop.f32.mrf.mxu3 }
  0xe0   :  { %v800_v6 = vpop.f32.mrf.mxu2 }
  0xed   :  { %v811_v22 = vpop.f32.mrf.mxu0 }
  0xee   :  { %v812_v25 = vadd.f32 %v811_v22, %v799_v23 }
  0xf0   :  { %v824_v24 = vpop.f32.mrf.mxu1 }
  0xf1   :  { %v825_v30 = vadd.f32 %v824_v24, %v812_v25 }
  0xf5   :  { %v837_v27 = vpop.f32.mrf.mxu3  ;;  %v813_v28 = vpop.f32.mrf.mxu0 }
  0xf6   :  { %v838_v33 = vadd.f32 %v837_v27, %v825_v30 }
  0xf8   :  { %v850_v31 = vpop.f32.mrf.mxu2  ;;  %v826_v34 = vpop.f32.mrf.mxu1 }
  0xf9   :  { %v851_v36 = vadd.f32 %v850_v31, %v838_v33 }
  0xfd   :  { %v839_v37 = vpop.f32.mrf.mxu3  ;;  %v863_v38 = vpop.f32.mrf.mxu0 }
  0xfe   :  { %v864_v41 = vadd.f32 %v863_v38, %v851_v36 }
 0x100   :  { %v852_v42 = vpop.f32.mrf.mxu2  ;;  %v868_v43 = vmax.f32 %v864_v41, 0.0 }
 0x102   :  { %v871_v45 = vrot.slane %v868_v43, 6 }
 0x104   :  { %v873_v46 = vsel %vm872_vm1, %v867_v44, %v871_v45 }
 0x105   :  { %v865_v47 = vpop.f32.mrf.mxu0  ;;  %875 = vst [vmem:[#allocation8] sm:$0xf] %v873_v46 }
 0x106   :  { %886 = dma.vmem_to_hbm [thread:$0]  %s882_s2, 64, %s884_s30, [#allocation4]  }
 0x107   :  { %1492 = dma.done.wait [#allocation4], 64  }
 0x108   :  { %1493 = vsyncadd [#allocation4], 4294967232 }
 0x109   :  { %891 = vsyncpa [#allocation3], 1 }
 0x10a   :  { %892 = vsyncpa [#allocation6], 1 }
 0x10b   :  { %893 = vsyncpa [#allocation4], 1 }

</bundles_post_ra>
